<compile_context>
chip_gen: v7x
topology: tpu7x:2x2x1
jax: 0.10.0
libtpu: 0.0.40
codegen_flags: <defaults>
</compile_context>

<pallas_src>
import functools

import jax
import jax.numpy as jnp
from jax.experimental import pallas as pl
from jax.experimental.pallas import tpu as pltpu


def _moe_kernel(x_ref, w_ref, b_ref, y_ref, stats_ref, *,
                num_experts, top_k, out_dim, gate_rows, imgs_per_block):
    """Channels-on-sublane / tokens-on-lane MoE tile.

    x_ref     : (nb, C, HW_TILE) f32   activation slab (NCHW, cast to bf16 here)
    w_ref     : (gate_rows + E*O, C) bf16  fused [w_gate^T ; 0-pad ; W_e^T] rows
    b_ref     : (O, gate_rows) f32     expert biases as columns (pad cols = 0)
    y_ref     : (nb, O, HW_TILE) out_dtype  mixed expert output (NCHW slab)
    stats_ref : (1, gate_rows, 128) f32  lane0 = importance_e, lane1 = load_e
    """
    w = w_ref[...]                                   # (R, C) bf16, constant block
    b = b_ref[...]                                   # (O, gate_rows) f32
    neg = jnp.float32(-jnp.inf)

    imp_acc = jnp.zeros((gate_rows, 1), jnp.float32)
    load_acc = jnp.zeros((gate_rows, 1), jnp.float32)

    for i in range(imgs_per_block):                  # static, small
        # in-kernel bf16 cast (VPU, hidden under the MXU); DMA stays f32.
        x = x_ref[i].astype(jnp.bfloat16)            # (C, hw)

        # ---- single fused MXU push: gate logits + all expert outputs -------
        fused = jnp.dot(w, x, preferred_element_type=jnp.float32)   # (R, hw) f32
        hw = fused.shape[-1]

        logits = fused[0:gate_rows, :]               # rows >= E are pad
        row = jax.lax.broadcasted_iota(jnp.int32, (gate_rows, hw), 0)
        work = jnp.where(row < num_experts, logits, neg)

        # ---- top-k mask (iterative first-occurrence argmax; k tiny, static)
        m = jnp.max(work, axis=0, keepdims=True)     # top-1 == softmax max
        mask = jnp.zeros((gate_rows, hw), dtype=jnp.bool_)
        cur_max = m
        for it in range(top_k):
            if it > 0:
                cur_max = jnp.max(work, axis=0, keepdims=True)
            is_max = work == cur_max
            first = jnp.min(jnp.where(is_max, row, gate_rows),
                            axis=0, keepdims=True)
            one_hot = row == first                   # first occurrence (torch.topk ties)
            mask = jnp.logical_or(mask, one_hot)
            work = jnp.where(one_hot, neg, work)

        # ---- softmax over the selected top-k logits -------------------------
        p = jnp.where(mask, jnp.exp(logits - m), 0.0)
        denom = jnp.sum(p, axis=0, keepdims=True)    # (1, hw)
        gates = p * pl.reciprocal(denom, approx=True)   # EUP vrcp; ~2^-12 rel err

        # ---- expert mixture ------------------------------------------------
        # bias term via a tiny MXU dot (== sum_e gates_e * b_e); removes the
        # (E*O, hw) broadcast add and the separate `eo` copy entirely.
        acc = jnp.dot(b, gates, preferred_element_type=jnp.float32)  # (O, hw)
        for e in range(num_experts):                 # static
            lo = gate_rows + e * out_dim
            acc = acc + gates[e:e + 1, :] * fused[lo:lo + out_dim, :]
        y_ref[i] = acc.astype(y_ref.dtype)           # lane-dense (O, hw) store

        # ---- per-tile gate stats (replaces dense (T, E) gates writeback) ----
        imp_acc = imp_acc + jnp.sum(gates, axis=1, keepdims=True)
        load_acc = load_acc + jnp.sum((gates > 0.0).astype(jnp.float32),
                                      axis=1, keepdims=True)

    lane = jax.lax.broadcasted_iota(jnp.int32, (gate_rows, 128), 1)
    stats_ref[0] = (jnp.where(lane == 0, imp_acc, 0.0)
                    + jnp.where(lane == 1, load_acc, 0.0))


def _cv_squared(v):
    eps = 1e-10
    if v.shape[0] == 1:
        return jnp.zeros(())
    v = v.astype(jnp.float32)
    # torch.Tensor.var() default is unbiased (ddof=1)
    return jnp.var(v, ddof=1) / (jnp.mean(v) ** 2 + eps)


def _default_num_parallel():
    """Grid steps to aim for: >=2 only on chips with 2 TensorCores (v7x)."""
    try:
        dev = jax.devices()[0]
        kind = (getattr(dev, "device_kind", "") or "").lower()
        cores = getattr(dev, "num_cores", None)
        if isinstance(cores, int) and cores > 1:
            return int(cores)
        if "v7" in kind:
            return 2
    except Exception:
        pass
    return 1           # v5e / v6e: 1 TC -> collapse the grid, save step overhead


def prepare_moe_params(w_gate, w_experts, b_experts):
    """Build the fused weight / bias blocks ONCE (hoisted out of the hot path).

    w_gate    : (C, E)     linear gate weight
    w_experts : (E, C, O)  1x1-conv expert weights (per-token linear)
    b_experts : (E, O)     expert biases
    returns (w_fused (gate_rows+E*O, C) bf16, b_mat (O, gate_rows) f32)
    """
    c, e = w_gate.shape
    e2, c2, o = w_experts.shape
    assert e2 == e and c2 == c
    gate_rows = ((e + 7) // 8) * 8                   # pad gate rows to a sublane tile
    w_gate_t = jnp.transpose(w_gate, (1, 0))                              # (E, C)
    w_exp_t = jnp.transpose(w_experts, (0, 2, 1)).reshape(e * o, c)       # (E*O, C)
    pad = jnp.zeros((gate_rows - e, c), w_gate.dtype)
    w_fused = jnp.concatenate([w_gate_t, pad, w_exp_t], axis=0).astype(jnp.bfloat16)
    b_mat = jnp.zeros((o, gate_rows), jnp.float32)
    b_mat = b_mat.at[:, :e].set(jnp.transpose(b_experts, (1, 0)).astype(jnp.float32))
    return w_fused, b_mat


def moe_layer_forward(x_nchw, w_fused, b_mat, *, num_experts, top_k,
                      loss_coef=0.01, hw_tile=None, num_parallel=None,
                      out_dtype=jnp.bfloat16):
    """MoE_layer.forward (eval mode) with the hot path in a Pallas kernel.

    Pass out_dtype=jnp.float32 if the downstream consumer needs f32 output.
    """
    n, c, h, w = x_nchw.shape
    o, gate_rows = b_mat.shape
    e = num_experts
    assert top_k <= e
    assert gate_rows == ((e + 7) // 8) * 8
    assert w_fused.shape == (gate_rows + e * o, c)
    hw = h * w

    if num_parallel is None:
        num_parallel = _default_num_parallel()
    if hw_tile is None:
        # cap at 512 lanes: the tile limiter is f32 vreg pressure from the
        # (gate_rows+E*O, hw_tile) fused intermediate, not VMEM.
        hw_tile = hw if hw <= 512 else 512
        if hw % hw_tile != 0:
            hw_tile = hw                             # full-row block (legal; may mask)
    assert hw % hw_tile == 0
    # if hw_tile is not a 128-multiple the stores become lane-masked vst.msk
    # (correct, just slower); prefer 128-multiple H*W.
    n_hw = hw // hw_tile

    # images per block: largest divisor of n that still yields >= num_parallel
    # grid steps (v7x: 2 parallel steps across its 2 TCs; v5e/v6e: 1 step).
    nb = n
    for cand in range(n, 0, -1):
        if n % cand == 0 and (n // cand) * n_hw >= num_parallel:
            nb = cand
            break
    n_batch_blocks = n // nb
    num_steps = n_batch_blocks * n_hw

    # Activations stay NCHW and stay f32: (N, C, H*W) is a free reshape and the
    # bf16 cast happens inside the kernel (no extra HBM pass).
    x_slab = x_nchw.reshape(n, c, hw)

    kernel = functools.partial(_moe_kernel, num_experts=e, top_k=top_k,
                               out_dim=o, gate_rows=gate_rows,
                               imgs_per_block=nb)

    y_slab, stats = pl.pallas_call(
        kernel,
        out_shape=(jax.ShapeDtypeStruct((n, o, hw), out_dtype),
                   jax.ShapeDtypeStruct((num_steps, gate_rows, 128), jnp.float32)),
        grid_spec=pltpu.PrefetchScalarGridSpec(
            num_scalar_prefetch=0,
            grid=(n_batch_blocks, n_hw),
            in_specs=[
                pl.BlockSpec((nb, c, hw_tile), lambda i, j: (i, 0, j)),
                pl.BlockSpec((gate_rows + e * o, c), lambda i, j: (0, 0)),
                pl.BlockSpec((o, gate_rows), lambda i, j: (0, 0)),
            ],
            out_specs=[
                pl.BlockSpec((nb, o, hw_tile), lambda i, j: (i, 0, j)),
                pl.BlockSpec((1, gate_rows, 128),
                             lambda i, j, n_hw=n_hw: (i * n_hw + j, 0, 0)),
            ],
        ),
        compiler_params=pltpu.CompilerParams(
            dimension_semantics=("parallel", "parallel")),
        # NOTE: weight/bias blocks are tiny here; when C/O/E scale up on v7x
        # (64 MiB VMEM), bound VMEM with vmem_limit_bytes and single-buffer the
        # constant-index weight spec (pipeline_mode=pl.Buffered(1)).
    )(x_slab, w_fused, b_mat)

    # tiny E-sized reductions of the per-tile stats, kept in plain JAX
    importance = stats[:, :e, 0].sum(axis=0)
    load = stats[:, :e, 1].sum(axis=0)
    loss = (_cv_squared(importance) + _cv_squared(load)) * loss_coef

    y = y_slab.reshape(n, o, h, w)                   # already NCHW, free reshape
    return y, loss


def _reference_forward(x_nchw, w_gate, w_experts, b_experts, *, top_k,
                       loss_coef=0.01):
    """Pure-JAX reference with the same dense-mixture math (bf16 MXU inputs)."""
    n, c, h, w = x_nchw.shape
    e, _, o = w_experts.shape
    tokens = jnp.transpose(x_nchw, (0, 2, 3, 1)).reshape(-1, c)
    tok_bf = tokens.astype(jnp.bfloat16)
    logits = jnp.dot(tok_bf, w_gate.astype(jnp.bfloat16),
                     preferred_element_type=jnp.float32)
    topk_vals, topk_idx = jax.lax.top_k(logits, top_k)
    gates_k = jax.nn.softmax(topk_vals, axis=-1)
    gates = (jax.nn.one_hot(topk_idx, e, dtype=jnp.float32)
             * gates_k[..., None]).sum(axis=1)
    out_all = jnp.einsum('tc,eco->teo', tok_bf, w_experts.astype(jnp.bfloat16),
                         preferred_element_type=jnp.float32) + b_experts[None]
    y_tok = (out_all * gates[:, :, None]).sum(axis=1)
    importance = gates.sum(axis=0)
    load = (gates > 0).sum(axis=0)
    loss = (_cv_squared(importance) + _cv_squared(load)) * loss_coef
    y = y_tok.reshape(n, h, w, o).transpose(0, 3, 1, 2)
    return y, loss


if __name__ == "__main__":
    # moe_cfg: in_channels=16, out_channels=16, num_experts=4, top_k=2,
    #          gating='linear', noisy_gating irrelevant in eval mode.
    N, C, H, W = 2, 16, 16, 16
    E, O, K = 4, 16, 2

    key = jax.random.PRNGKey(0)
    kx, kg, kw, kb = jax.random.split(key, 4)

    x = jax.random.normal(kx, (N, C, H, W), dtype=jnp.float32)
    # NOTE: PyTorch inits w_gate to zeros (degenerate all-tied gating); we use
    # deterministic small-random weights so the top-k path is exercised.
    w_gate = 0.1 * jax.random.normal(kg, (C, E), dtype=jnp.float32)
    # experts: nn.Conv2d(C, O, 1) -> weight (O, C, 1, 1); stored here as (E, C, O)
    w_experts = 0.1 * jax.random.normal(kw, (E, C, O), dtype=jnp.float32)
    b_experts = 0.1 * jax.random.normal(kb, (E, O), dtype=jnp.float32)

    # fused weight construction done ONCE (hoisted out of the per-call path)
    w_fused, b_mat = prepare_moe_params(w_gate, w_experts, b_experts)

    y, loss = moe_layer_forward(x, w_fused, b_mat, num_experts=E, top_k=K)
    y = jax.block_until_ready(y)
    loss = jax.block_until_ready(loss)

    y_ref, loss_ref = _reference_forward(x, w_gate, w_experts, b_experts, top_k=K)
    assert y.shape == (N, O, H, W)
    # Tolerances: bf16 MXU inputs (mirrored in the reference), bf16 kernel
    # output (~2^-8 rel), and the EUP approx reciprocal (~2^-12 rel).
    assert jnp.allclose(y.astype(jnp.float32), y_ref, atol=1e-2, rtol=1e-2), \
        "output mismatch"
    assert jnp.allclose(loss, loss_ref, atol=1e-5, rtol=2e-2), "loss mismatch"

    print("KERNEL_OK")
</pallas_src>

<mosaic_0001>
module attributes {stable_mosaic.version = 11 : i64} {
  func.func @_moe_kernel(%arg0: i32, %arg1: i32, %arg2: memref<2x16x256xf32, #tpu.memory_space<vmem>>, %arg3: memref<72x16xbf16, #tpu.memory_space<vmem>>, %arg4: memref<16x8xf32, #tpu.memory_space<vmem>>, %arg5: memref<2x16x256xbf16, #tpu.memory_space<vmem>>, %arg6: memref<1x8x128xf32, #tpu.memory_space<vmem>>) attributes {dimension_semantics = [#tpu.dimension_semantics<parallel>, #tpu.dimension_semantics<parallel>], iteration_bounds = array<i64: 1, 1>, scalar_prefetch = 0 : i64, scratch_operands = 0 : i64, tpu.core_type = #tpu.core_type<tc>, window_params = [{transform_indices = @transform_0, window_bounds = array<i64: 2, 16, 256>}, {pipeline_mode = #tpu.pipeline_mode<synchronous>, transform_indices = @transform_1, window_bounds = array<i64: 72, 16>}, {pipeline_mode = #tpu.pipeline_mode<synchronous>, transform_indices = @transform_2, window_bounds = array<i64: 16, 8>}, {transform_indices = @transform_3, window_bounds = array<i64: 2, 16, 256>}, {transform_indices = @transform_4, window_bounds = array<i64: 1, 8, 128>}]} {
    %c0 = arith.constant 0 : index
    %c0_0 = arith.constant 0 : index
    %0 = vector.load %arg3[%c0, %c0_0] : memref<72x16xbf16, #tpu.memory_space<vmem>>, vector<72x16xbf16>
    %c0_1 = arith.constant 0 : index
    %c0_2 = arith.constant 0 : index
    %1 = vector.load %arg4[%c0_1, %c0_2] : memref<16x8xf32, #tpu.memory_space<vmem>>, vector<16x8xf32>
    %cst = arith.constant 0.000000e+00 : f32
    %2 = vector.broadcast %cst : f32 to vector<8x1xf32>
    %cst_3 = arith.constant 0.000000e+00 : f32
    %3 = vector.broadcast %cst_3 : f32 to vector<8x1xf32>
    %c0_4 = arith.constant 0 : index
    %c0_5 = arith.constant 0 : index
    %c0_6 = arith.constant 0 : index
    %4 = vector.load %arg2[%c0_4, %c0_5, %c0_6] : memref<2x16x256xf32, #tpu.memory_space<vmem>>, vector<1x16x256xf32>
    %5 = vector.shape_cast %4 : vector<1x16x256xf32> to vector<16x256xf32>
    %6 = arith.truncf %5 : vector<16x256xf32> to vector<16x256xbf16>
    %cst_7 = arith.constant dense<0.000000e+00> : vector<72x256xf32>
    %7 = tpu.matmul %0, %6, %cst_7 {dimension_numbers = #tpu.dot_dimension_numbers<[1], [0], [0], [1], [0, 0, 1, 1], [], []>} : vector<72x16xbf16>, vector<16x256xbf16>, vector<72x256xf32> -> vector<72x256xf32>
    %8 = vector.extract_strided_slice %7 {offsets = [0, 0], sizes = [8, 256], strides = [1, 1]} : vector<72x256xf32> to vector<8x256xf32>
    %9 = tpu.iota {dimensions = array<i32: 0>} : vector<8x256xi32>
    %c4_i32 = arith.constant 4 : i32
    %10 = vector.broadcast %c4_i32 : i32 to vector<8x256xi32>
    %11 = arith.cmpi slt, %9, %10 : vector<8x256xi32>
    %cst_8 = arith.constant 0xFF800000 : f32
    %12 = vector.broadcast %cst_8 : f32 to vector<8x256xf32>
    %13 = arith.select %11, %8, %12 : vector<8x256xi1>, vector<8x256xf32>
    %cst_9 = arith.constant dense<0xFF800000> : vector<256xf32>
    %14 = vector.multi_reduction <maximumf>, %13, %cst_9 [0] : vector<8x256xf32> to vector<256xf32>
    %15 = vector.shape_cast %14 : vector<256xf32> to vector<1x256xf32>
    %false = arith.constant false
    %16 = vector.broadcast %false : i1 to vector<8x256xi1>
    %17 = vector.broadcast %15 : vector<1x256xf32> to vector<8x256xf32>
    %18 = arith.cmpf oeq, %13, %17 : vector<8x256xf32>
    %c8_i32 = arith.constant 8 : i32
    %19 = vector.broadcast %c8_i32 : i32 to vector<8x256xi32>
    %20 = arith.select %18, %9, %19 : vector<8x256xi1>, vector<8x256xi32>
    %cst_10 = arith.constant dense<2147483647> : vector<256xi32>
    %21 = vector.multi_reduction <minsi>, %20, %cst_10 [0] : vector<8x256xi32> to vector<256xi32>
    %22 = vector.shape_cast %21 : vector<256xi32> to vector<1x256xi32>
    %23 = vector.broadcast %22 : vector<1x256xi32> to vector<8x256xi32>
    %24 = arith.cmpi eq, %9, %23 : vector<8x256xi32>
    %25 = arith.ori %16, %24 : vector<8x256xi1>
    %cst_11 = arith.constant 0xFF800000 : f32
    %26 = vector.broadcast %cst_11 : f32 to vector<8x256xf32>
    %27 = arith.select %24, %26, %13 : vector<8x256xi1>, vector<8x256xf32>
    %cst_12 = arith.constant dense<0xFF800000> : vector<256xf32>
    %28 = vector.multi_reduction <maximumf>, %27, %cst_12 [0] : vector<8x256xf32> to vector<256xf32>
    %29 = vector.shape_cast %28 : vector<256xf32> to vector<1x256xf32>
    %30 = vector.broadcast %29 : vector<1x256xf32> to vector<8x256xf32>
    %31 = arith.cmpf oeq, %27, %30 : vector<8x256xf32>
    %c8_i32_13 = arith.constant 8 : i32
    %32 = vector.broadcast %c8_i32_13 : i32 to vector<8x256xi32>
    %33 = arith.select %31, %9, %32 : vector<8x256xi1>, vector<8x256xi32>
    %cst_14 = arith.constant dense<2147483647> : vector<256xi32>
    %34 = vector.multi_reduction <minsi>, %33, %cst_14 [0] : vector<8x256xi32> to vector<256xi32>
    %35 = vector.shape_cast %34 : vector<256xi32> to vector<1x256xi32>
    %36 = vector.broadcast %35 : vector<1x256xi32> to vector<8x256xi32>
    %37 = arith.cmpi eq, %9, %36 : vector<8x256xi32>
    %38 = arith.ori %25, %37 : vector<8x256xi1>
    %39 = vector.broadcast %15 : vector<1x256xf32> to vector<8x256xf32>
    %40 = arith.subf %8, %39 : vector<8x256xf32>
    %41 = math.exp %40 : vector<8x256xf32>
    %cst_15 = arith.constant 0.000000e+00 : f32
    %42 = vector.broadcast %cst_15 : f32 to vector<8x256xf32>
    %43 = arith.select %38, %41, %42 : vector<8x256xi1>, vector<8x256xf32>
    %cst_16 = arith.constant dense<0.000000e+00> : vector<256xf32>
    %44 = vector.multi_reduction <add>, %43, %cst_16 [0] : vector<8x256xf32> to vector<256xf32>
    %45 = vector.shape_cast %44 : vector<256xf32> to vector<1x256xf32>
    %46 = tpu.reciprocal %45 {approx = true} : vector<1x256xf32> -> vector<1x256xf32>
    %47 = vector.broadcast %46 : vector<1x256xf32> to vector<8x256xf32>
    %48 = arith.mulf %43, %47 : vector<8x256xf32>
    %cst_17 = arith.constant dense<0.000000e+00> : vector<16x256xf32>
    %49 = tpu.matmul %1, %48, %cst_17 {dimension_numbers = #tpu.dot_dimension_numbers<[1], [0], [0], [1], [0, 0, 1, 1], [], []>} : vector<16x8xf32>, vector<8x256xf32>, vector<16x256xf32> -> vector<16x256xf32>
    %50 = vector.extract_strided_slice %48 {offsets = [0, 0], sizes = [1, 256], strides = [1, 1]} : vector<8x256xf32> to vector<1x256xf32>
    %51 = vector.extract_strided_slice %7 {offsets = [8, 0], sizes = [16, 256], strides = [1, 1]} : vector<72x256xf32> to vector<16x256xf32>
    %52 = vector.broadcast %50 : vector<1x256xf32> to vector<16x256xf32>
    %53 = arith.mulf %52, %51 : vector<16x256xf32>
    %54 = arith.addf %49, %53 : vector<16x256xf32>
    %55 = vector.extract_strided_slice %48 {offsets = [1, 0], sizes = [1, 256], strides = [1, 1]} : vector<8x256xf32> to vector<1x256xf32>
    %56 = vector.extract_strided_slice %7 {offsets = [24, 0], sizes = [16, 256], strides = [1, 1]} : vector<72x256xf32> to vector<16x256xf32>
    %57 = vector.broadcast %55 : vector<1x256xf32> to vector<16x256xf32>
    %58 = arith.mulf %57, %56 : vector<16x256xf32>
    %59 = arith.addf %54, %58 : vector<16x256xf32>
    %60 = vector.extract_strided_slice %48 {offsets = [2, 0], sizes = [1, 256], strides = [1, 1]} : vector<8x256xf32> to vector<1x256xf32>
    %61 = vector.extract_strided_slice %7 {offsets = [40, 0], sizes = [16, 256], strides = [1, 1]} : vector<72x256xf32> to vector<16x256xf32>
    %62 = vector.broadcast %60 : vector<1x256xf32> to vector<16x256xf32>
    %63 = arith.mulf %62, %61 : vector<16x256xf32>
    %64 = arith.addf %59, %63 : vector<16x256xf32>
    %65 = vector.extract_strided_slice %48 {offsets = [3, 0], sizes = [1, 256], strides = [1, 1]} : vector<8x256xf32> to vector<1x256xf32>
    %66 = vector.extract_strided_slice %7 {offsets = [56, 0], sizes = [16, 256], strides = [1, 1]} : vector<72x256xf32> to vector<16x256xf32>
    %67 = vector.broadcast %65 : vector<1x256xf32> to vector<16x256xf32>
    %68 = arith.mulf %67, %66 : vector<16x256xf32>
    %69 = arith.addf %64, %68 : vector<16x256xf32>
    %70 = arith.truncf %69 : vector<16x256xf32> to vector<16x256xbf16>
    %c0_18 = arith.constant 0 : index
    %c0_19 = arith.constant 0 : index
    %c0_20 = arith.constant 0 : index
    %71 = vector.load %arg5[%c0_18, %c0_19, %c0_20] : memref<2x16x256xbf16, #tpu.memory_space<vmem>>, vector<1x16x256xbf16>
    %72 = vector.shape_cast %71 : vector<1x16x256xbf16> to vector<16x256xbf16>
    %73 = vector.shape_cast %70 : vector<16x256xbf16> to vector<1x16x256xbf16>
    tpu.vector_store %arg5[%c0_18, %c0_19, %c0_20], %73 {strides = array<i32>} : memref<2x16x256xbf16, #tpu.memory_space<vmem>>, vector<1x16x256xbf16>,
    %cst_21 = arith.constant dense<0.000000e+00> : vector<8xf32>
    %74 = vector.multi_reduction <add>, %48, %cst_21 [1] : vector<8x256xf32> to vector<8xf32>
    %75 = vector.shape_cast %74 : vector<8xf32> to vector<8x1xf32>
    %76 = arith.addf %2, %75 : vector<8x1xf32>
    %cst_22 = arith.constant 0.000000e+00 : f32
    %77 = vector.broadcast %cst_22 : f32 to vector<8x256xf32>
    %78 = arith.cmpf ogt, %48, %77 : vector<8x256xf32>
    %79 = arith.extui %78 : vector<8x256xi1> to vector<8x256xi32>
    %80 = arith.sitofp %79 : vector<8x256xi32> to vector<8x256xf32>
    %cst_23 = arith.constant dense<0.000000e+00> : vector<8xf32>
    %81 = vector.multi_reduction <add>, %80, %cst_23 [1] : vector<8x256xf32> to vector<8xf32>
    %82 = vector.shape_cast %81 : vector<8xf32> to vector<8x1xf32>
    %83 = arith.addf %3, %82 : vector<8x1xf32>
    %c1 = arith.constant 1 : index
    %c0_24 = arith.constant 0 : index
    %c0_25 = arith.constant 0 : index
    %84 = vector.load %arg2[%c1, %c0_24, %c0_25] : memref<2x16x256xf32, #tpu.memory_space<vmem>>, vector<1x16x256xf32>
    %85 = vector.shape_cast %84 : vector<1x16x256xf32> to vector<16x256xf32>
    %86 = arith.truncf %85 : vector<16x256xf32> to vector<16x256xbf16>
    %cst_26 = arith.constant dense<0.000000e+00> : vector<72x256xf32>
    %87 = tpu.matmul %0, %86, %cst_26 {dimension_numbers = #tpu.dot_dimension_numbers<[1], [0], [0], [1], [0, 0, 1, 1], [], []>} : vector<72x16xbf16>, vector<16x256xbf16>, vector<72x256xf32> -> vector<72x256xf32>
    %88 = vector.extract_strided_slice %87 {offsets = [0, 0], sizes = [8, 256], strides = [1, 1]} : vector<72x256xf32> to vector<8x256xf32>
    %89 = tpu.iota {dimensions = array<i32: 0>} : vector<8x256xi32>
    %c4_i32_27 = arith.constant 4 : i32
    %90 = vector.broadcast %c4_i32_27 : i32 to vector<8x256xi32>
    %91 = arith.cmpi slt, %89, %90 : vector<8x256xi32>
    %cst_28 = arith.constant 0xFF800000 : f32
    %92 = vector.broadcast %cst_28 : f32 to vector<8x256xf32>
    %93 = arith.select %91, %88, %92 : vector<8x256xi1>, vector<8x256xf32>
    %cst_29 = arith.constant dense<0xFF800000> : vector<256xf32>
    %94 = vector.multi_reduction <maximumf>, %93, %cst_29 [0] : vector<8x256xf32> to vector<256xf32>
    %95 = vector.shape_cast %94 : vector<256xf32> to vector<1x256xf32>
    %false_30 = arith.constant false
    %96 = vector.broadcast %false_30 : i1 to vector<8x256xi1>
    %97 = vector.broadcast %95 : vector<1x256xf32> to vector<8x256xf32>
    %98 = arith.cmpf oeq, %93, %97 : vector<8x256xf32>
    %c8_i32_31 = arith.constant 8 : i32
    %99 = vector.broadcast %c8_i32_31 : i32 to vector<8x256xi32>
    %100 = arith.select %98, %89, %99 : vector<8x256xi1>, vector<8x256xi32>
    %cst_32 = arith.constant dense<2147483647> : vector<256xi32>
    %101 = vector.multi_reduction <minsi>, %100, %cst_32 [0] : vector<8x256xi32> to vector<256xi32>
    %102 = vector.shape_cast %101 : vector<256xi32> to vector<1x256xi32>
    %103 = vector.broadcast %102 : vector<1x256xi32> to vector<8x256xi32>
    %104 = arith.cmpi eq, %89, %103 : vector<8x256xi32>
    %105 = arith.ori %96, %104 : vector<8x256xi1>
    %cst_33 = arith.constant 0xFF800000 : f32
    %106 = vector.broadcast %cst_33 : f32 to vector<8x256xf32>
    %107 = arith.select %104, %106, %93 : vector<8x256xi1>, vector<8x256xf32>
    %cst_34 = arith.constant dense<0xFF800000> : vector<256xf32>
    %108 = vector.multi_reduction <maximumf>, %107, %cst_34 [0] : vector<8x256xf32> to vector<256xf32>
    %109 = vector.shape_cast %108 : vector<256xf32> to vector<1x256xf32>
    %110 = vector.broadcast %109 : vector<1x256xf32> to vector<8x256xf32>
    %111 = arith.cmpf oeq, %107, %110 : vector<8x256xf32>
    %c8_i32_35 = arith.constant 8 : i32
    %112 = vector.broadcast %c8_i32_35 : i32 to vector<8x256xi32>
    %113 = arith.select %111, %89, %112 : vector<8x256xi1>, vector<8x256xi32>
    %cst_36 = arith.constant dense<2147483647> : vector<256xi32>
    %114 = vector.multi_reduction <minsi>, %113, %cst_36 [0] : vector<8x256xi32> to vector<256xi32>
    %115 = vector.shape_cast %114 : vector<256xi32> to vector<1x256xi32>
    %116 = vector.broadcast %115 : vector<1x256xi32> to vector<8x256xi32>
    %117 = arith.cmpi eq, %89, %116 : vector<8x256xi32>
    %118 = arith.ori %105, %117 : vector<8x256xi1>
    %119 = vector.broadcast %95 : vector<1x256xf32> to vector<8x256xf32>
    %120 = arith.subf %88, %119 : vector<8x256xf32>
    %121 = math.exp %120 : vector<8x256xf32>
    %cst_37 = arith.constant 0.000000e+00 : f32
    %122 = vector.broadcast %cst_37 : f32 to vector<8x256xf32>
    %123 = arith.select %118, %121, %122 : vector<8x256xi1>, vector<8x256xf32>
    %cst_38 = arith.constant dense<0.000000e+00> : vector<256xf32>
    %124 = vector.multi_reduction <add>, %123, %cst_38 [0] : vector<8x256xf32> to vector<256xf32>
    %125 = vector.shape_cast %124 : vector<256xf32> to vector<1x256xf32>
    %126 = tpu.reciprocal %125 {approx = true} : vector<1x256xf32> -> vector<1x256xf32>
    %127 = vector.broadcast %126 : vector<1x256xf32> to vector<8x256xf32>
    %128 = arith.mulf %123, %127 : vector<8x256xf32>
    %cst_39 = arith.constant dense<0.000000e+00> : vector<16x256xf32>
    %129 = tpu.matmul %1, %128, %cst_39 {dimension_numbers = #tpu.dot_dimension_numbers<[1], [0], [0], [1], [0, 0, 1, 1], [], []>} : vector<16x8xf32>, vector<8x256xf32>, vector<16x256xf32> -> vector<16x256xf32>
    %130 = vector.extract_strided_slice %128 {offsets = [0, 0], sizes = [1, 256], strides = [1, 1]} : vector<8x256xf32> to vector<1x256xf32>
    %131 = vector.extract_strided_slice %87 {offsets = [8, 0], sizes = [16, 256], strides = [1, 1]} : vector<72x256xf32> to vector<16x256xf32>
    %132 = vector.broadcast %130 : vector<1x256xf32> to vector<16x256xf32>
    %133 = arith.mulf %132, %131 : vector<16x256xf32>
    %134 = arith.addf %129, %133 : vector<16x256xf32>
    %135 = vector.extract_strided_slice %128 {offsets = [1, 0], sizes = [1, 256], strides = [1, 1]} : vector<8x256xf32> to vector<1x256xf32>
    %136 = vector.extract_strided_slice %87 {offsets = [24, 0], sizes = [16, 256], strides = [1, 1]} : vector<72x256xf32> to vector<16x256xf32>
    %137 = vector.broadcast %135 : vector<1x256xf32> to vector<16x256xf32>
    %138 = arith.mulf %137, %136 : vector<16x256xf32>
    %139 = arith.addf %134, %138 : vector<16x256xf32>
    %140 = vector.extract_strided_slice %128 {offsets = [2, 0], sizes = [1, 256], strides = [1, 1]} : vector<8x256xf32> to vector<1x256xf32>
    %141 = vector.extract_strided_slice %87 {offsets = [40, 0], sizes = [16, 256], strides = [1, 1]} : vector<72x256xf32> to vector<16x256xf32>
    %142 = vector.broadcast %140 : vector<1x256xf32> to vector<16x256xf32>
    %143 = arith.mulf %142, %141 : vector<16x256xf32>
    %144 = arith.addf %139, %143 : vector<16x256xf32>
    %145 = vector.extract_strided_slice %128 {offsets = [3, 0], sizes = [1, 256], strides = [1, 1]} : vector<8x256xf32> to vector<1x256xf32>
    %146 = vector.extract_strided_slice %87 {offsets = [56, 0], sizes = [16, 256], strides = [1, 1]} : vector<72x256xf32> to vector<16x256xf32>
    %147 = vector.broadcast %145 : vector<1x256xf32> to vector<16x256xf32>
    %148 = arith.mulf %147, %146 : vector<16x256xf32>
    %149 = arith.addf %144, %148 : vector<16x256xf32>
    %150 = arith.truncf %149 : vector<16x256xf32> to vector<16x256xbf16>
    %c1_40 = arith.constant 1 : index
    %c0_41 = arith.constant 0 : index
    %c0_42 = arith.constant 0 : index
    %151 = vector.load %arg5[%c1_40, %c0_41, %c0_42] : memref<2x16x256xbf16, #tpu.memory_space<vmem>>, vector<1x16x256xbf16>
    %152 = vector.shape_cast %151 : vector<1x16x256xbf16> to vector<16x256xbf16>
    %153 = vector.shape_cast %150 : vector<16x256xbf16> to vector<1x16x256xbf16>
    tpu.vector_store %arg5[%c1_40, %c0_41, %c0_42], %153 {strides = array<i32>} : memref<2x16x256xbf16, #tpu.memory_space<vmem>>, vector<1x16x256xbf16>,
    %cst_43 = arith.constant dense<0.000000e+00> : vector<8xf32>
    %154 = vector.multi_reduction <add>, %128, %cst_43 [1] : vector<8x256xf32> to vector<8xf32>
    %155 = vector.shape_cast %154 : vector<8xf32> to vector<8x1xf32>
    %156 = arith.addf %76, %155 : vector<8x1xf32>
    %cst_44 = arith.constant 0.000000e+00 : f32
    %157 = vector.broadcast %cst_44 : f32 to vector<8x256xf32>
    %158 = arith.cmpf ogt, %128, %157 : vector<8x256xf32>
    %159 = arith.extui %158 : vector<8x256xi1> to vector<8x256xi32>
    %160 = arith.sitofp %159 : vector<8x256xi32> to vector<8x256xf32>
    %cst_45 = arith.constant dense<0.000000e+00> : vector<8xf32>
    %161 = vector.multi_reduction <add>, %160, %cst_45 [1] : vector<8x256xf32> to vector<8xf32>
    %162 = vector.shape_cast %161 : vector<8xf32> to vector<8x1xf32>
    %163 = arith.addf %83, %162 : vector<8x1xf32>
    %164 = tpu.iota {dimensions = array<i32: 1>} : vector<8x128xi32>
    %c0_i32 = arith.constant 0 : i32
    %165 = vector.broadcast %c0_i32 : i32 to vector<8x128xi32>
    %166 = arith.cmpi eq, %164, %165 : vector<8x128xi32>
    %cst_46 = arith.constant 0.000000e+00 : f32
    %167 = vector.shape_cast %156 : vector<8x1xf32> to vector<8x1xf32>
    %168 = vector.broadcast %167 : vector<8x1xf32> to vector<8x128xf32>
    %169 = vector.broadcast %cst_46 : f32 to vector<8x128xf32>
    %170 = arith.select %166, %168, %169 : vector<8x128xi1>, vector<8x128xf32>
    %c1_i32 = arith.constant 1 : i32
    %171 = vector.broadcast %c1_i32 : i32 to vector<8x128xi32>
    %172 = arith.cmpi eq, %164, %171 : vector<8x128xi32>
    %cst_47 = arith.constant 0.000000e+00 : f32
    %173 = vector.shape_cast %163 : vector<8x1xf32> to vector<8x1xf32>
    %174 = vector.broadcast %173 : vector<8x1xf32> to vector<8x128xf32>
    %175 = vector.broadcast %cst_47 : f32 to vector<8x128xf32>
    %176 = arith.select %172, %174, %175 : vector<8x128xi1>, vector<8x128xf32>
    %177 = arith.addf %170, %176 : vector<8x128xf32>
    %c0_48 = arith.constant 0 : index
    %c0_49 = arith.constant 0 : index
    %c0_50 = arith.constant 0 : index
    %178 = vector.load %arg6[%c0_48, %c0_49, %c0_50] : memref<1x8x128xf32, #tpu.memory_space<vmem>>, vector<1x8x128xf32>
    %179 = vector.shape_cast %178 : vector<1x8x128xf32> to vector<8x128xf32>
    %180 = vector.shape_cast %177 : vector<8x128xf32> to vector<1x8x128xf32>
    tpu.vector_store %arg6[%c0_48, %c0_49, %c0_50], %180 {strides = array<i32>} : memref<1x8x128xf32, #tpu.memory_space<vmem>>, vector<1x8x128xf32>,
    return
  }
  func.func @transform_0(%arg0: i32, %arg1: i32) -> (i32, i32, i32) {
    %c0_i32 = arith.constant 0 : i32
    %c0_i32_0 = arith.constant 0 : i32
    return %arg0, %c0_i32, %arg1 : i32, i32, i32
  }
  func.func @transform_1(%arg0: i32, %arg1: i32) -> (i32, i32) {
    %c0_i32 = arith.constant 0 : i32
    %c0_i32_0 = arith.constant 0 : i32
    %c0_i32_1 = arith.constant 0 : i32
    return %c0_i32, %c0_i32_0 : i32, i32
  }
  func.func @transform_2(%arg0: i32, %arg1: i32) -> (i32, i32) {
    %c0_i32 = arith.constant 0 : i32
    %c0_i32_0 = arith.constant 0 : i32
    %c0_i32_1 = arith.constant 0 : i32
    return %c0_i32, %c0_i32_0 : i32, i32
  }
  func.func @transform_3(%arg0: i32, %arg1: i32) -> (i32, i32, i32) {
    %c0_i32 = arith.constant 0 : i32
    %c0_i32_0 = arith.constant 0 : i32
    return %arg0, %c0_i32, %arg1 : i32, i32, i32
  }
  func.func @transform_4(%arg0: i32, %arg1: i32) -> (i32, i32, i32) {
    %c1_i32 = arith.constant 1 : i32
    %0 = arith.muli %arg0, %c1_i32 : i32
    %1 = arith.addi %0, %arg1 : i32
    %c0_i32 = arith.constant 0 : i32
    %c0_i32_0 = arith.constant 0 : i32
    %c0_i32_1 = arith.constant 0 : i32
    return %1, %c0_i32, %c0_i32_0 : i32, i32, i32
  }
}

</mosaic_0001>

<bundles_post_ra>
// kernel: tpu_custom_call.1
= control target key start
LH: loop header
LB: loop body
LE: loop exit
PB: predicated region body
PF: predicated region fallthrough
CT: control target
= control target key end

     0   :  { %10 = vsyncpa [#allocation3], 0  ;;  %v941_v5 = vmov 0   ;;  %vm60_vm0 = vcmask 130048   ;;  %s1295_s0 = inlined_call_operand.vmem [shape: f32[2,16,256], index: 0, kind: input, shape index: {}]   ;;  %s1296_s1 = inlined_call_operand.vmem [shape: bf16[72,16], index: 1, kind: input, shape index: {}]   ;;  %s1297_s2 = inlined_call_operand.vmem [shape: f32[16,8], index: 2, kind: input, shape index: {}]   ;;  %s1298_s3 = inlined_call_operand.hbm [shape: bf16[2,16,256], index: 3, kind: output, shape index: {0}]   ;;  %s1299_s4 = inlined_call_operand.hbm [shape: f32[1,8,128], index: 4, kind: output, shape index: {1}]  }
   0x1   :  { %v32_v0 = vld [vmem:[%s1295_s0 + $0x8] sm:$0xff]  ;;  %v34_v1 = vld [vmem:[%s1295_s0 + $0x18] sm:$0xff]  ;;  %v31_v2 = vld [vmem:[%s1295_s0] sm:$0xff]  ;;  %108 = vmatprep.mubr.bf16.mxu0 %v941_v5 }
   0x2   :  { %v36_v3 = vpack.c.bf16 %v34_v1, %v32_v0  ;;  %v33_v4 = vld [vmem:[%s1295_s0 + $0x10] sm:$0xff]  ;;  %v988_v7 = vld [vmem:[%s1296_s1] sm:$0xff]  }
   0x3   :  { %v35_v6 = vpack.c.bf16 %v33_v4, %v31_v2 }
   0x4   :  { %76 = vmatprep.subr.bf16.mxu0 %v36_v3 }
   0x5   :  { %77 = vmatpush1.bf16.msra.mxu0 %v35_v6 }
   0x6   :  { %11 = vsyncpa [#allocation5], 0  ;;  %v996_v8 = vld [vmem:[%s1296_s1 + $0x8] sm:$0xff]   ;;  %v1004_v9 = vld [vmem:[%s1296_s1 + $0x10] sm:$0xff]   ;;  %v942_v12 = vmov 0.0   ;;  %v157_v13 = vlaneseq }
   0x7   :  { %v1012_v10 = vld [vmem:[%s1296_s1 + $0x18] sm:$0xff]   ;;  %v1020_v11 = vld [vmem:[%s1296_s1 + $0x20] ss:$0 sps:$4 sm:$0xff]   ;;  %345 = vmatprep.mubr.f32.mxu1 %v942_v12 }
   0x8   :  { %836 = vmatmul.mubr.msk.bf16.vlgmr.msra.gmra.mrb[0].mxu0 %vm60_vm0, %v988_v7  ;;  %v1027_v14 = vshrl.u32 %v157_v13, 7 }
   0x9   :  { %118 = vmatprep.mubr.bf16.mxu0 %v941_v5 }
   0xa   :  { %vm159_vm1 = vcmp.lt.s32.totalorder %v1027_v14, 4 }
  0x10   :  { %837 = vmatmul.mubr.msk.bf16.gmra.mrb[4].mxu0 %vm60_vm0, %v996_v8 }
  0x11   :  { %128 = vmatprep.mubr.bf16.mxu0 %v941_v5 }
  0x18   :  { %838 = vmatmul.mubr.msk.bf16.gmra.mrb[8].mxu0 %vm60_vm0, %v1004_v9 }
  0x19   :  { %138 = vmatprep.mubr.bf16.mxu0 %v941_v5 }
  0x20   :  { %839 = vmatmul.mubr.msk.bf16.gmra.mrb[12].mxu0 %vm60_vm0, %v1012_v10 }
  0x21   :  { %148 = vmatprep.mubr.bf16.mxu0 %v941_v5 }
  0x28   :  { %840 = vmatmul.mubr.msk.bf16.gmra.mrb[16].mxu0 %vm60_vm0, %v1020_v11 }
  0x29   :  { %700 = vmatprep.mubr.f32.mxu0 %v942_v12 }
  0xdb   :  { %v1030_v15 = vpop.f32.mrb[0].mxu0 }
  0xdc   :  { %v160_v16 = vsel %vm159_vm1, %v1030_v15, -inf  ;;  %v1035_v17 = vpop.f32.mrb[1].mxu0 }
  0xdd   :  { %v162_v18 = vrot.slane %v160_v16, 4  ;;  %v161_v19 = vsel %vm159_vm1, %v1035_v17, -inf  ;;  %v1040_v20 = vpop.f32.mrb[2].mxu0 }
  0xde   :  { %v168_v21 = vrot.slane %v161_v19, 4  ;;  %v1042_v22 = vpop.f32.mrb[3].mxu0 }
  0xdf   :  { %v163_v23 = vmax.f32 %v160_v16, %v162_v18 }
  0xe0   :  { %v169_v24 = vmax.f32 %v161_v19, %v168_v21 }
  0xe1   :  { %v164_v25 = vrot.slane %v163_v23, 2 }
  0xe2   :  { %v170_v26 = vrot.slane %v169_v24, 2 }
  0xe3   :  { %v165_v27 = vmax.f32 %v163_v23, %v164_v25  ;;  %v1044_v28 = vpop.f32.mrb[4].mxu0 }
  0xe4   :  { %v171_v29 = vmax.f32 %v169_v24, %v170_v26  ;;  %v1046_v30 = vpop.f32.mrb[5].mxu0 }
  0xe5   :  { %v166_v31 = vrot.slane %v165_v27, 1  ;;  %v1048_v32 = vpop.f32.mrb[6].mxu0 }
  0xe6   :  { %v172_v33 = vrot.slane %v171_v29, 1  ;;  %v1050_v34 = vpop.f32.mrb[7].mxu0 }
  0xe7   :  { %v167_v35 = vmax.f32 %v165_v27, %v166_v31 }
  0xe8   :  { %v173_v36 = vmax.f32 %v171_v29, %v172_v33 }
  0xe9   :  { %vm174_vm2 = vcmp.eq.f32.partialorder %v160_v16, %v167_v35  ;;  %v238_v24 = vsub.f32 %v1030_v15, %v167_v35 }
  0xea   :  { %v176_v37 = vsel %vm174_vm2, %v1027_v14, 8  ;;  %vm175_vm3 = vcmp.eq.f32.partialorder %v161_v19, %v173_v36 }
  0xeb   :  { %v178_v38 = vrot.slane %v176_v37, 4  ;;  %v177_v39 = vsel %vm175_vm3, %v1027_v14, 8  ;;  %v1054_v40 = vpop.f32.mrb[8].mxu0  ;;  %v240_v31 = vmul.f32 1.442695, %v238_v24  ;;  %v1097_v24 = vsub.s32 1, %v1027_v14 }
  0xec   :  { %v187_v41 = vrot.slane %v177_v39, 4  ;;  %v1056_v42 = vpop.f32.mrb[9].mxu0 }
  0xed   :  { %vm179_vm4 = vcmp.lt.s32.totalorder %v176_v37, %v178_v38  ;;  %v1058_v43 = vpop.f32.mrb[10].mxu0  ;;  %877 = vpow2.f32 %v240_v31 }
  0xee   :  { %v180_v44 = vsel %vm179_vm4, %v176_v37, %v178_v38  ;;  %vm188_vm5 = vcmp.lt.s32.totalorder %v177_v39, %v187_v41  ;;  %v1060_v45 = vpop.f32.mrb[11].mxu0 }
  0xef   :  { %v181_v46 = vrot.slane %v180_v44, 2  ;;  %v189_v47 = vsel %vm188_vm5, %v177_v39, %v187_v41 }
  0xf0   :  { %v190_v48 = vrot.slane %v189_v47, 2 }
  0xf1   :  { %vm182_vm6 = vcmp.lt.s32.totalorder %v180_v44, %v181_v46 }
  0xf2   :  { %v183_v49 = vsel %vm182_vm6, %v180_v44, %v181_v46  ;;  %vm191_vm7 = vcmp.lt.s32.totalorder %v189_v47, %v190_v48 }
  0xf3   :  { %v184_v50 = vrot.slane %v183_v49, 1  ;;  %v192_v51 = vsel %vm191_vm7, %v189_v47, %v190_v48  ;;  %v1062_v52 = vpop.f32.mrb[12].mxu0 }
  0xf4   :  { %v193_v53 = vrot.slane %v192_v51, 1  ;;  %v1064_v54 = vpop.f32.mrb[13].mxu0 }
  0xf5   :  { %vm185_vm8 = vcmp.lt.s32.totalorder %v183_v49, %v184_v50  ;;  %v1066_v55 = vpop.f32.mrb[14].mxu0 }
  0xf6   :  { %v186_v56 = vsel %vm185_vm8, %v183_v49, %v184_v50  ;;  %vm194_vm9 = vcmp.lt.s32.totalorder %v192_v51, %v193_v53  ;;  %v1068_v57 = vpop.f32.mrb[15].mxu0 }
  0xf7   :  { %vm196_vm10 = vcmp.eq.s32.totalorder %v1027_v14, %v186_v56  ;;  %v195_v58 = vsel %vm194_vm9, %v192_v51, %v193_v53  ;;  %v878_v50 = vpop.eup %877 }
  0xf8   :  { %v198_v59 = vsel %vm196_vm10, -inf, %v160_v16  ;;  %vm197_vm11 = vcmp.eq.s32.totalorder %v1027_v14, %v195_v58  ;;  %v848_v58 = vld [vmem:[%s1295_s0 + $0x28] sm:$0xff] }
  0xf9   :  { %v200_v60 = vrot.slane %v198_v59, 4  ;;  %v199_v61 = vsel %vm197_vm11, -inf, %v161_v19  ;;  %v239_v19 = vsub.f32 %v1035_v17, %v173_v36 }
  0xfa   :  { %v206_v62 = vrot.slane %v199_v61, 4 }
  0xfb   :  { %v201_v63 = vmax.f32 %v198_v59, %v200_v60  ;;  %v1076_v0 = vpop.f32.mrb[16].mxu0  ;;  %v242_v38 = vmul.f32 1.442695, %v239_v19  ;;  %v850_v19 = vld [vmem:[%s1295_s0 + $0x38] sm:$0xff] }
  0xfc   :  { %v207_v1 = vmax.f32 %v199_v61, %v206_v62  ;;  %v1078_v2 = vpop.f32.mrb[17].mxu0 }
  0xfd   :  { %v202_v3 = vrot.slane %v201_v63, 2  ;;  %v154_v4 = vpop.f32.mrb[18].mxu0  ;;  %879 = vpow2.f32 %v242_v38 }
  0xfe   :  { %v208_v6 = vrot.slane %v207_v1, 2  ;;  %v155_v18 = vpop.f32.mrb[19].mxu0 }
  0xff   :  { %v203_v21 = vmax.f32 %v201_v63, %v202_v3 }
 0x100   :  { %v209_v23 = vmax.f32 %v207_v1, %v208_v6 }
 0x101   :  { %v204_v16 = vrot.slane %v203_v21, 1 }
 0x102   :  { %v210_v25 = vrot.slane %v209_v23, 1 }
 0x103   :  { %v205_v26 = vmax.f32 %v203_v21, %v204_v16  ;;  %v1091_v16 = vsub.s32 0, %v1027_v14 }
 0x104   :  { %v211_v27 = vmax.f32 %v209_v23, %v210_v25  ;;  %v1100_v25 = vsub.s32 2, %v1027_v14 }
 0x105   :  { %vm212_vm12 = vcmp.eq.f32.partialorder %v198_v59, %v205_v26  ;;  %v1103_v26 = vsub.s32 3, %v1027_v14 }
 0x106   :  { %v214_v29 = vsel %vm212_vm12, %v1027_v14, 8  ;;  %vm213_vm13 = vcmp.eq.f32.partialorder %v199_v61, %v211_v27  ;;  %v847_v27 = vld [vmem:[%s1295_s0 + $0x20] sm:$0xff] }
 0x107   :  { %v216_v33 = vrot.slane %v214_v29, 4  ;;  %v215_v37 = vsel %vm213_vm13, %v1027_v14, 8  ;;  %v880_v51 = vpop.eup %879 }
 0x108   :  { %v225_v39 = vrot.slane %v215_v37, 4 }
 0x109   :  { %vm217_vm14 = vcmp.lt.s32.totalorder %v214_v29, %v216_v33 }
 0x10a   :  { %v218_v41 = vsel %vm217_vm14, %v214_v29, %v216_v33  ;;  %vm226_vm15 = vcmp.lt.s32.totalorder %v215_v37, %v225_v39  ;;  %v849_v29 = vld [vmem:[%s1295_s0 + $0x30] sm:$0xff] }
 0x10b   :  { %v219_v15 = vrot.slane %v218_v41, 2  ;;  %v227_v35 = vsel %vm226_vm15, %v215_v37, %v225_v39  ;;  %v440_v39 = vpack.c.bf16 %v850_v19, %v848_v58 }
 0x10c   :  { %v228_v44 = vrot.slane %v227_v35, 2 }
 0x10d   :  { %vm220_vm2 = vcmp.lt.s32.totalorder %v218_v41, %v219_v15 }
 0x10e   :  { %v221_v17 = vsel %vm220_vm2, %v218_v41, %v219_v15  ;;  %vm229_vm3 = vcmp.lt.s32.totalorder %v227_v35, %v228_v44  ;;  %v439_v41 = vpack.c.bf16 %v849_v29, %v847_v27 }
 0x10f   :  { %v222_v36 = vrot.slane %v221_v17, 1  ;;  %v230_v46 = vsel %vm229_vm3, %v227_v35, %v228_v44 }
 0x110   :  { %v231_v47 = vrot.slane %v230_v46, 1 }
 0x111   :  { %vm223_vm4 = vcmp.lt.s32.totalorder %v221_v17, %v222_v36 }
 0x112   :  { %v224_v48 = vsel %vm223_vm4, %v221_v17, %v222_v36  ;;  %vm232_vm5 = vcmp.lt.s32.totalorder %v230_v46, %v231_v47  ;;  %v1121_v36 = vld [vmem:[%s1297_s2] sm:$0xff] }
 0x113   :  { %vm234_vm6 = vcmp.eq.s32.totalorder %v1027_v14, %v224_v48  ;;  %v233_v49 = vsel %vm232_vm5, %v230_v46, %v231_v47 }
 0x114   :  { %vm236_vm7 = vmor %vm196_vm10, %vm234_vm6  ;;  %vm235_vm8 = vcmp.eq.s32.totalorder %v1027_v14, %v233_v49  ;;  %vm274_vm10 = vcmask 64512  }
 0x115   :  { %v244_v53 = vsel %vm236_vm7, %v878_v50, 0.0  ;;  %vm237_vm9 = vmor %vm197_vm11, %vm235_vm8 }
 0x116   :  { %v246_v59 = vrot.slane %v244_v53, 4  ;;  %v245_v60 = vsel %vm237_vm9, %v880_v51, 0.0 }
 0x117   :  { %v252_v61 = vrot.slane %v245_v60, 4 }
 0x118   :  { %v247_v62 = vadd.f32 %v246_v59, %v244_v53 }
 0x119   :  { %v253_v63 = vadd.f32 %v252_v61, %v245_v60 }
 0x11a   :  { %v248_v1 = vrot.slane %v247_v62, 2 }
 0x11b   :  { %v254_v3 = vrot.slane %v253_v63, 2 }
 0x11c   :  { %v249_v4 = vadd.f32 %v248_v1, %v247_v62 }
 0x11d   :  { %v255_v6 = vadd.f32 %v254_v3, %v253_v63 }
 0x11e   :  { %v250_v18 = vrot.slane %v249_v4, 1 }
 0x11f   :  { %v256_v21 = vrot.slane %v255_v6, 1 }
 0x120   :  { %v251_v56 = vadd.f32 %v250_v18, %v249_v4 }
 0x121   :  { %v257_v23 = vadd.f32 %v256_v21, %v255_v6 }
 0x122   :  { %881 = vrcp.f32 %v251_v56 }
 0x123   :  { %883 = vrcp.f32 %v257_v23 }
 0x12c   :  { %v882_v31 = vpop.eup %881 }
 0x12d   :  { %v884_v33 = vpop.eup %883  ;;  %v260_v37 = vmul.f32 %v882_v31, %v244_v53 }
 0x12e   :  { %v261_v38 = vmul.f32 %v884_v33, %v245_v60 }
 0x12f   :  { %v265_v15 = vrot.slane %v260_v37, %v1091_v16  ;;  %v361_v35 = vrot.slane %v260_v37, %v1097_v24  ;;  %v377_v44 = vrot.slane %v260_v37, %v1100_v25  ;;  %v393_v17 = vrot.slane %v260_v37, %v1103_v26 }
 0x130   :  { %v269_v46 = vrot.slane %v261_v38, %v1091_v16  ;;  %v365_v47 = vrot.slane %v261_v38, %v1097_v24  ;;  %v381_v48 = vrot.slane %v261_v38, %v1100_v25  ;;  %v397_v49 = vrot.slane %v261_v38, %v1103_v26  ;;  %281 = vmatprep.subr.mxu1 %v261_v38 }
 0x131   :  { %v270_v50 = vmul.f32 %v265_v15, %v1040_v20  ;;  %v272_v51 = vmul.f32 %v265_v15, %v1044_v28  ;;  %v366_v53 = vmul.f32 %v361_v35, %v1048_v32  ;;  %v368_v59 = vmul.f32 %v361_v35, %v1054_v40  ;;  %282 = vmatpush1.msra.mxu1 %v260_v37 }
 0x132   :  { %v271_v60 = vmul.f32 %v269_v46, %v1042_v22  ;;  %v273_v61 = vmul.f32 %v269_v46, %v1046_v30  ;;  %v367_v62 = vmul.f32 %v365_v47, %v1050_v34  ;;  %v369_v63 = vmul.f32 %v365_v47, %v1056_v42  ;;  %841 = vmatmul.mubr.msk.f32.vlgmr.msra.gmra.mrb[0].mxu1 %vm274_vm10, %v1121_v36  ;;  %v1145_v22 = vld [vmem:[%s1297_s2 + $0x8] sm:$0xff]  ;;  %s943_s2 = smov [#allocation4]  }
 0x133   :  { %v382_v20 = vmul.f32 %v377_v44, %v1058_v43  ;;  %v383_v28 = vmul.f32 %v381_v48, %v1060_v45  ;;  %v384_v32 = vmul.f32 %v377_v44, %v1062_v52  ;;  %v385_v40 = vmul.f32 %v381_v48, %v1064_v54  ;;  %351 = vmatprep.mubr.f32.mxu1 %v942_v12  ;;  %s819_s17 = sshll.u32 %s943_s2, 4  ;;  %s820_s17 = int_to_ptr.vmem [resolvable:$true] %s819_s17 }
 0x134   :  { %v398_v30 = vmul.f32 %v393_v17, %v1066_v55  ;;  %v399_v34 = vmul.f32 %v397_v49, %v1068_v57  ;;  %v400_v42 = vmul.f32 %v393_v17, %v1076_v0  ;;  %v401_v43 = vmul.f32 %v397_v49, %v1078_v2  ;;  %441 = vmatprep.subr.bf16.mxu1 %v440_v39  ;;  %s893_s18 = scalar_lea.vmem %s820_s17, 128  ;;  %p898_p1 = scmp.lt.s32.totalorder %s820_s17, %s820_s17 }
 0x135   :  { %v420_v45 = vadd.f32 %v261_v38, %v260_v37  ;;  %vm424_vm11 = vcmp.gt.f32.partialorder %v260_v37, 0.0  ;;  %vm425_vm12 = vcmp.gt.f32.partialorder %v261_v38, 0.0  ;;  %442 = vmatpush1.bf16.msra.mxu1 %v439_v41  ;;  %p894_p0 = scmp.ne.s32.totalorder %s820_s17, %s893_s18  ;;  %p899_p2 = scmp.lt.s32.totalorder %s893_s18, %s893_s18 }
 0x136   :  { %v845_v52 = vsel %vm424_vm11, 1.0, %v942_v12  ;;  %v846_v54 = vsel %vm425_vm12, 1.0, %v942_v12  ;;  %842 = vmatmul.mubr.msk.f32.gmra.mrb[2].mxu1 %vm274_vm10, %v1145_v22 }
 0x137   :  { %421 = vadd.xlane.f32.xlu0 %v420_v45  ;;  %v430_v55 = vadd.f32 %v846_v54, %v845_v52  ;;  %473 = vmatprep.mubr.bf16.mxu1 %v941_v5  ;;  %p900_p3 = por %p899_p2, %p898_p1 }
 0x139   :  { %p901_p4 = pnand %p900_p3, %p894_p0 }
 0x13a   :  { %851 = vmatmul.mubr.msk.bf16.vlgmr.msra.gmra.mrb[4].mxu1 %vm60_vm0, %v988_v7 }
 0x13b   :  { %431 = vadd.xlane.f32.xlu0 %v430_v55  ;;  %483 = vmatprep.mubr.bf16.mxu1 %v941_v5 }
 0x142   :  { %852 = vmatmul.mubr.msk.bf16.gmra.mrb[8].mxu1 %vm60_vm0, %v996_v8 }
 0x143   :  { %493 = vmatprep.mubr.bf16.mxu1 %v941_v5 }
 0x14a   :  { %853 = vmatmul.mubr.msk.bf16.gmra.mrb[12].mxu1 %vm60_vm0, %v1004_v9 }
 0x14b   :  { %503 = vmatprep.mubr.bf16.mxu1 %v941_v5 }
 0x152   :  { %854 = vmatmul.mubr.msk.bf16.gmra.mrb[16].mxu1 %vm60_vm0, %v1012_v10 }
 0x153   :  { %513 = vmatprep.mubr.bf16.mxu1 %v941_v5 }
 0x15a   :  { %855 = vmatmul.mubr.msk.bf16.gmra.mrb[20].mxu1 %vm60_vm0, %v1020_v11 }
 0x205   :  { %v347_v7 = vpop.f32.mrb[0].mxu1 }
 0x206   :  { %v348_v57 = vadd.f32 %v347_v7, %v270_v50  ;;  %v349_v0 = vpop.f32.mrb[1].mxu1 }
 0x207   :  { %v350_v2 = vadd.f32 %v349_v0, %v271_v60 }
 0x208   :  { %v370_v8 = vadd.f32 %v366_v53, %v348_v57 }
 0x209   :  { %v371_v1 = vadd.f32 %v367_v62, %v350_v2  ;;  %v353_v3 = vpop.f32.mrb[2].mxu1 }
 0x20a   :  { %v386_v4 = vadd.f32 %v382_v20, %v370_v8  ;;  %v354_v6 = vadd.f32 %v353_v3, %v272_v51  ;;  %v355_v9 = vpop.f32.mrb[3].mxu1 }
 0x20b   :  { %v387_v18 = vadd.f32 %v383_v28, %v371_v1  ;;  %v356_v21 = vadd.f32 %v355_v9, %v273_v61 }
 0x20c   :  { %v402_v56 = vadd.f32 %v398_v30, %v386_v4  ;;  %v372_v23 = vadd.f32 %v368_v59, %v354_v6 }
 0x20d   :  { %v403_v10 = vadd.f32 %v399_v34, %v387_v18  ;;  %v373_v58 = vadd.f32 %v369_v63, %v356_v21  ;;  %v1170_v5 = vpop.f32.mrb[4].mxu1 }
 0x20e   :  { %v388_v19 = vadd.f32 %v384_v32, %v372_v23  ;;  %v522_v11 = vsel %vm159_vm1, %v1170_v5, -inf  ;;  %v1175_v27 = vpop.f32.mrb[5].mxu1 }
 0x20f   :  { %v862_v29 = vpack.c.bf16 %v403_v10, %v402_v56  ;;  %v389_v31 = vadd.f32 %v385_v40, %v373_v58  ;;  %v524_v33 = vrot.slane %v522_v11, 4  ;;  %v523_v37 = vsel %vm159_vm1, %v1175_v27, -inf  ;;  %v1180_v38 = vpop.f32.mrb[6].mxu1 }
 0x210   :  { %v404_v39 = vadd.f32 %v400_v42, %v388_v19  ;;  %v530_v41 = vrot.slane %v523_v37, 4  ;;  %v1182_v15 = vpop.f32.mrb[7].mxu1 }
 0x211   :  { %418 = vst [vmem:[#allocation2] sm:$0xff] %v862_v29  ;;  %v405_v35 = vadd.f32 %v401_v43, %v389_v31  ;;  %v525_v44 = vmax.f32 %v522_v11, %v524_v33 }
 0x212   :  { %v531_v17 = vmax.f32 %v523_v37, %v530_v41 }
 0x213   :  { %v863_v46 = vpack.c.bf16 %v405_v35, %v404_v39  ;;  %v526_v47 = vrot.slane %v525_v44, 2 }
 0x214   :  { %v532_v48 = vrot.slane %v531_v17, 2 }
 0x215   :  { %419 = vst [vmem:[#allocation2 + $0x8] sm:$0xff] %v863_v46  ;;  %v527_v49 = vmax.f32 %v525_v44, %v526_v47  ;;  %v1184_v50 = vpop.f32.mrb[8].mxu1 }
 0x216   :  { %v533_v51 = vmax.f32 %v531_v17, %v532_v48  ;;  %v1186_v53 = vpop.f32.mrb[9].mxu1 }
 0x217   :  { %v528_v59 = vrot.slane %v527_v49, 1  ;;  %v1188_v60 = vpop.f32.mrb[10].mxu1 }
 0x218   :  { %v534_v61 = vrot.slane %v533_v51, 1  ;;  %v1190_v62 = vpop.f32.mrb[11].mxu1 }
 0x219   :  { %v529_v63 = vmax.f32 %v527_v49, %v528_v59 }
 0x21a   :  { %v535_v20 = vmax.f32 %v533_v51, %v534_v61 }
 0x21b   :  { %vm536_vm0 = vcmp.eq.f32.partialorder %v522_v11, %v529_v63  ;;  %v600_v46 = vsub.f32 %v1170_v5, %v529_v63 }
 0x21c   :  { %v538_v28 = vsel %vm536_vm0, %v1027_v14, 8  ;;  %vm537_vm1 = vcmp.eq.f32.partialorder %v523_v37, %v535_v20 }
 0x21d   :  { %v540_v32 = vrot.slane %v538_v28, 4  ;;  %v539_v40 = vsel %vm537_vm1, %v1027_v14, 8  ;;  %v1194_v30 = vpop.f32.mrb[12].mxu1  ;;  %v602_v59 = vmul.f32 1.442695, %v600_v46 }
 0x21e   :  { %v549_v34 = vrot.slane %v539_v40, 4  ;;  %v1196_v42 = vpop.f32.mrb[13].mxu1 }
 0x21f   :  { %vm541_vm13 = vcmp.lt.s32.totalorder %v538_v28, %v540_v32  ;;  %v1198_v43 = vpop.f32.mrb[14].mxu1  ;;  %885 = vpow2.f32 %v602_v59 }
 0x220   :  { %v542_v45 = vsel %vm541_vm13, %v538_v28, %v540_v32  ;;  %vm550_vm14 = vcmp.lt.s32.totalorder %v539_v40, %v549_v34  ;;  %v1200_v52 = vpop.f32.mrb[15].mxu1 }
 0x221   :  { %v543_v54 = vrot.slane %v542_v45, 2  ;;  %v551_v55 = vsel %vm550_vm14, %v539_v40, %v549_v34 }
 0x222   :  { %v552_v7 = vrot.slane %v551_v55, 2 }
 0x223   :  { %vm544_vm15 = vcmp.lt.s32.totalorder %v542_v45, %v543_v54 }
 0x224   :  { %v545_v57 = vsel %vm544_vm15, %v542_v45, %v543_v54  ;;  %vm553_vm2 = vcmp.lt.s32.totalorder %v551_v55, %v552_v7 }
 0x225   :  { %v546_v0 = vrot.slane %v545_v57, 1  ;;  %v554_v2 = vsel %vm553_vm2, %v551_v55, %v552_v7  ;;  %v1202_v8 = vpop.f32.mrb[16].mxu1 }
 0x226   :  { %v555_v1 = vrot.slane %v554_v2, 1  ;;  %v1204_v3 = vpop.f32.mrb[17].mxu1 }
 0x227   :  { %vm547_vm3 = vcmp.lt.s32.totalorder %v545_v57, %v546_v0  ;;  %v1206_v4 = vpop.f32.mrb[18].mxu1 }
 0x228   :  { %v548_v6 = vsel %vm547_vm3, %v545_v57, %v546_v0  ;;  %vm556_vm4 = vcmp.lt.s32.totalorder %v554_v2, %v555_v1  ;;  %v1208_v9 = vpop.f32.mrb[19].mxu1 }
 0x229   :  { %vm558_vm5 = vcmp.eq.s32.totalorder %v1027_v14, %v548_v6  ;;  %v557_v18 = vsel %vm556_vm4, %v554_v2, %v555_v1  ;;  %v886_v0 = vpop.eup %885 }
 0x22a   :  { %v560_v21 = vsel %vm558_vm5, -inf, %v522_v11  ;;  %vm559_vm6 = vcmp.eq.s32.totalorder %v1027_v14, %v557_v18 }
 0x22b   :  { %v562_v56 = vrot.slane %v560_v21, 4  ;;  %v561_v23 = vsel %vm559_vm6, -inf, %v523_v37  ;;  %v601_v37 = vsub.f32 %v1175_v27, %v535_v20 }
 0x22c   :  { %v568_v10 = vrot.slane %v561_v23, 4 }
 0x22d   :  { %v563_v58 = vmax.f32 %v560_v21, %v562_v56  ;;  %v1216_v19 = vpop.f32.mrb[20].mxu1  ;;  %v604_v32 = vmul.f32 1.442695, %v601_v37 }
 0x22e   :  { %v569_v29 = vmax.f32 %v561_v23, %v568_v10  ;;  %v1218_v31 = vpop.f32.mrb[21].mxu1 }
 0x22f   :  { %v564_v33 = vrot.slane %v563_v58, 2  ;;  %v519_v39 = vpop.f32.mrb[22].mxu1  ;;  %887 = vpow2.f32 %v604_v32 }
 0x230   :  { %v570_v41 = vrot.slane %v569_v29, 2  ;;  %v520_v35 = vpop.f32.mrb[23].mxu1 }
 0x231   :  { %v565_v44 = vmax.f32 %v563_v58, %v564_v33 }
 0x232   :  { %v571_v17 = vmax.f32 %v569_v29, %v570_v41 }
 0x233   :  { %v566_v11 = vrot.slane %v565_v44, 1 }
 0x234   :  { %v572_v47 = vrot.slane %v571_v17, 1 }
 0x235   :  { %v567_v48 = vmax.f32 %v565_v44, %v566_v11 }
 0x236   :  { %v573_v49 = vmax.f32 %v571_v17, %v572_v47 }
 0x237   :  { %vm574_vm7 = vcmp.eq.f32.partialorder %v560_v21, %v567_v48 }
 0x238   :  { %v576_v51 = vsel %vm574_vm7, %v1027_v14, 8  ;;  %vm575_vm8 = vcmp.eq.f32.partialorder %v561_v23, %v573_v49 }
 0x239   :  { %v578_v61 = vrot.slane %v576_v51, 4  ;;  %v577_v28 = vsel %vm575_vm8, %v1027_v14, 8  ;;  %v888_v2 = vpop.eup %887 }
 0x23a   :  { %v587_v40 = vrot.slane %v577_v28, 4 }
 0x23b   :  { %vm579_vm9 = vcmp.lt.s32.totalorder %v576_v51, %v578_v61 }
 0x23c   :  { %v580_v34 = vsel %vm579_vm9, %v576_v51, %v578_v61  ;;  %vm588_vm11 = vcmp.lt.s32.totalorder %v577_v28, %v587_v40 }
 0x23d   :  { %v581_v5 = vrot.slane %v580_v34, 2  ;;  %v589_v63 = vsel %vm588_vm11, %v577_v28, %v587_v40 }
 0x23e   :  { %v590_v45 = vrot.slane %v589_v63, 2 }
 0x23f   :  { %vm582_vm12 = vcmp.lt.s32.totalorder %v580_v34, %v581_v5 }
 0x240   :  { %v583_v27 = vsel %vm582_vm12, %v580_v34, %v581_v5  ;;  %vm591_vm0 = vcmp.lt.s32.totalorder %v589_v63, %v590_v45 }
 0x241   :  { %v584_v20 = vrot.slane %v583_v27, 1  ;;  %v592_v54 = vsel %vm591_vm0, %v589_v63, %v590_v45 }
 0x242   :  { %v593_v55 = vrot.slane %v592_v54, 1 }
 0x243   :  { %vm585_vm1 = vcmp.lt.s32.totalorder %v583_v27, %v584_v20 }
 0x244   :  { %v586_v7 = vsel %vm585_vm1, %v583_v27, %v584_v20  ;;  %vm594_vm13 = vcmp.lt.s32.totalorder %v592_v54, %v593_v55 }
 0x245   :  { %vm596_vm14 = vcmp.eq.s32.totalorder %v1027_v14, %v586_v7  ;;  %v595_v57 = vsel %vm594_vm13, %v592_v54, %v593_v55 }
 0x246   :  { %vm598_vm15 = vmor %vm558_vm5, %vm596_vm14  ;;  %vm597_vm2 = vcmp.eq.s32.totalorder %v1027_v14, %v595_v57 }
 0x247   :  { %v606_v1 = vsel %vm598_vm15, %v886_v0, 0.0  ;;  %vm599_vm3 = vmor %vm559_vm6, %vm597_vm2 }
 0x248   :  { %v608_v21 = vrot.slane %v606_v1, 4  ;;  %v607_v56 = vsel %vm599_vm3, %v888_v2, 0.0 }
 0x249   :  { %v614_v23 = vrot.slane %v607_v56, 4 }
 0x24a   :  { %v609_v10 = vadd.f32 %v608_v21, %v606_v1 }
 0x24b   :  { %v615_v58 = vadd.f32 %v614_v23, %v607_v56 }
 0x24c   :  { %v610_v29 = vrot.slane %v609_v10, 2 }
 0x24d   :  { %v616_v33 = vrot.slane %v615_v58, 2 }
 0x24e   :  { %v611_v39 = vadd.f32 %v610_v29, %v609_v10 }
 0x24f   :  { %v617_v41 = vadd.f32 %v616_v33, %v615_v58 }
 0x250   :  { %v612_v35 = vrot.slane %v611_v39, 1 }
 0x251   :  { %v618_v44 = vrot.slane %v617_v41, 1 }
 0x252   :  { %v613_v6 = vadd.f32 %v612_v35, %v611_v39 }
 0x253   :  { %v619_v17 = vadd.f32 %v618_v44, %v617_v41 }
 0x254   :  { %889 = vrcp.f32 %v613_v6 }
 0x255   :  { %891 = vrcp.f32 %v619_v17 }
 0x25e   :  { %v890_v11 = vpop.eup %889 }
 0x25f   :  { %v892_v46 = vpop.eup %891  ;;  %v622_v47 = vmul.f32 %v890_v11, %v606_v1 }
 0x260   :  { %v623_v14 = vmul.f32 %v892_v46, %v607_v56 }
 0x261   :  { %v627_v18 = vrot.slane %v622_v47, %v1091_v16  ;;  %v716_v48 = vrot.slane %v622_v47, %v1097_v24  ;;  %v732_v37 = vrot.slane %v622_v47, %v1100_v25  ;;  %v748_v49 = vrot.slane %v622_v47, %v1103_v26 }
 0x262   :  { %v631_v51 = vrot.slane %v623_v14, %v1091_v16  ;;  %v720_v59 = vrot.slane %v623_v14, %v1097_v24  ;;  %v736_v61 = vrot.slane %v623_v14, %v1100_v25  ;;  %v752_v28 = vrot.slane %v623_v14, %v1103_v26  ;;  %636 = vmatprep.subr.mxu0 %v623_v14 }
 0x263   :  { %v632_v32 = vmul.f32 %v627_v18, %v1180_v38  ;;  %v1240_v40 = vmul.f32 %v627_v18, %v1184_v50  ;;  %v721_v34 = vmul.f32 %v716_v48, %v1188_v60  ;;  %v1244_v5 = vmul.f32 %v716_v48, %v1194_v30  ;;  %637 = vmatpush1.msra.mxu0 %v622_v47 }
 0x264   :  { %v633_v16 = vmul.f32 %v631_v51, %v1182_v15  ;;  %v635_v24 = vmul.f32 %v631_v51, %v1186_v53  ;;  %v722_v25 = vmul.f32 %v720_v59, %v1190_v62  ;;  %v1250_v26 = vmul.f32 %v720_v59, %v1196_v42  ;;  %856 = vmatmul.mubr.msk.f32.vlgmr.msra.gmra.mrb[20].mxu0 %vm274_vm10, %v1121_v36 }
 0x265   :  { %v737_v38 = vmul.f32 %v732_v37, %v1198_v43  ;;  %v738_v50 = vmul.f32 %v736_v61, %v1200_v52  ;;  %v739_v60 = vmul.f32 %v732_v37, %v1202_v8  ;;  %v740_v30 = vmul.f32 %v736_v61, %v1204_v3  ;;  %706 = vmatprep.mubr.f32.mxu0 %v942_v12  ;;  %v422_v8 = vpop.xlane.xlu0 %421 }
 0x266   :  { %v753_v15 = vmul.f32 %v748_v49, %v1206_v4  ;;  %v754_v53 = vmul.f32 %v752_v28, %v1208_v9  ;;  %v755_v62 = vmul.f32 %v748_v49, %v1216_v19  ;;  %v756_v42 = vmul.f32 %v752_v28, %v1218_v31 }
 0x267   :  { %v776_v63 = vadd.f32 %v623_v14, %v622_v47  ;;  %vm780_vm4 = vcmp.gt.f32.partialorder %v622_v47, 0.0  ;;  %vm781_vm5 = vcmp.gt.f32.partialorder %v623_v14, 0.0  ;;  %v791_v3 = vand.u32 127, %v157_v13 }
 0x268   :  { %v860_v36 = vsel %vm780_vm4, 1.0, %v942_v12  ;;  %v861_v43 = vsel %vm781_vm5, 1.0, %v942_v12  ;;  %857 = vmatmul.mubr.msk.f32.gmra.mrb[22].mxu0 %vm274_vm10, %v1145_v22 }
 0x269   :  { %777 = vadd.xlane.f32.xlu1 %v776_v63  ;;  %v786_v52 = vadd.f32 %v861_v43, %v860_v36  ;;  %v432_v19 = vpop.xlane.xlu0 %431  ;;  %vm792_vm6 = vcmp.eq.s32.totalorder %v791_v3, 0  ;;  %vm794_vm7 = vcmp.eq.s32.totalorder %v791_v3, 1 }
 0x26d   :  { %787 = vadd.xlane.f32.xlu1 %v786_v52 }
 0x2f6   :  { %v778_v4 = vpop.xlane.xlu1 %777 }
 0x2f7   :  { %v779_v9 = vadd.f32 %v778_v4, %v422_v8 }
 0x2f9   :  { %v793_v27 = vsel %vm792_vm6, %v779_v9, 0.0 }
 0x2fa   :  { %v788_v31 = vpop.xlane.xlu1 %787 }
 0x2fb   :  { %v789_v45 = vadd.f32 %v788_v31, %v432_v19 }
 0x2fd   :  { %v795_v12 = vsel %vm794_vm7, %v789_v45, 0.0 }
 0x2fe   :  { %v796_v20 = vadd.f32 %v795_v12, %v793_v27 }
 0x300   :  { %797 = vst [vmem:[#allocation4] sm:$0xff] %v796_v20 }
 0x301   :  { %904 = shalt.err (!%p901_p4)
}
 0x302   :  { %s905_s21 = scalar_lea.hbm %s1299_s4, 128 }
 0x303   :  { %p906_p5 = scmp.ne.s32.totalorder %s1299_s4, %s905_s21  ;;  %p909_p6 = scmp.lt.u32.totalorder %s905_s21, %s1299_s4 }
 0x305   :  { %p911_p7 = pnand %p909_p6, %p906_p5 }
 0x307   :  { %914 = shalt.err (!%p911_p7)
}
 0x308   :  { %822 = dma.vmem_to_hbm [thread:$0]  %s820_s17, 128, %s1299_s4, [#allocation5]  }
 0x309   :  { %s944_s4 = smov [#allocation2]  }
 0x30a   :  { %s803_s28 = sshll.u32 %s944_s4, 4  ;;  %s804_s28 = int_to_ptr.vmem [resolvable:$true] %s803_s28 }
 0x30b   :  { %s915_s29 = scalar_lea.vmem %s804_s28, 512  ;;  %p920_p9 = scmp.lt.s32.totalorder %s804_s28, %s804_s28 }
 0x30c   :  { %p916_p8 = scmp.ne.s32.totalorder %s804_s28, %s915_s29  ;;  %p921_p10 = scmp.lt.s32.totalorder %s915_s29, %s915_s29 }
 0x30e   :  { %p922_p11 = por %p921_p10, %p920_p9 }
 0x310   :  { %p923_p12 = pnand %p922_p11, %p916_p8 }
 0x337   :  { %v702_v13 = vpop.f32.mrb[20].mxu0 }
 0x338   :  { %v703_v22 = vadd.f32 %v702_v13, %v632_v32  ;;  %v704_v54 = vpop.f32.mrb[21].mxu0 }
 0x339   :  { %v705_v55 = vadd.f32 %v704_v54, %v633_v16 }
 0x33a   :  { %v725_v7 = vadd.f32 %v721_v34, %v703_v22 }
 0x33b   :  { %v726_v57 = vadd.f32 %v722_v25, %v705_v55  ;;  %v708_v0 = vpop.f32.mrb[22].mxu0 }
 0x33c   :  { %v741_v2 = vadd.f32 %v737_v38, %v725_v7  ;;  %v709_v1 = vadd.f32 %v708_v0, %v1240_v40  ;;  %v710_v21 = vpop.f32.mrb[23].mxu0 }
 0x33d   :  { %v742_v56 = vadd.f32 %v738_v50, %v726_v57  ;;  %v711_v23 = vadd.f32 %v710_v21, %v635_v24 }
 0x33e   :  { %v757_v10 = vadd.f32 %v753_v15, %v741_v2  ;;  %v727_v58 = vadd.f32 %v1244_v5, %v709_v1 }
 0x33f   :  { %v758_v29 = vadd.f32 %v754_v53, %v742_v56  ;;  %v728_v33 = vadd.f32 %v1250_v26, %v711_v23 }
 0x340   :  { %v743_v39 = vadd.f32 %v739_v60, %v727_v58 }
 0x341   :  { %v864_v41 = vpack.c.bf16 %v758_v29, %v757_v10  ;;  %v744_v35 = vadd.f32 %v740_v30, %v728_v33 }
 0x342   :  { %v759_v44 = vadd.f32 %v755_v62, %v743_v39 }
 0x343   :  { %774 = vst [vmem:[#allocation2 + $0x10] sm:$0xff] %v864_v41  ;;  %v760_v6 = vadd.f32 %v756_v42, %v744_v35 }
 0x345   :  { %v865_v17 = vpack.c.bf16 %v760_v6, %v759_v44 }
 0x347   :  { %775 = vst [vmem:[#allocation2 + $0x18] sm:$0xff] %v865_v17 }
 0x348   :  { %926 = shalt.err (!%p923_p12)
}
 0x349   :  { %s927_s6 = scalar_lea.hbm %s1298_s3, 512 }
 0x34a   :  { %p928_p13 = scmp.ne.s32.totalorder %s1298_s3, %s927_s6  ;;  %p931_p0 = scmp.lt.u32.totalorder %s927_s6, %s1298_s3 }
 0x34c   :  { %p933_p1 = pnand %p931_p0, %p928_p13 }
 0x34e   :  { %936 = shalt.err (!%p933_p1)
}
 0x34f   :  { %s945_s10 = smov 128   ;;  %s946_s11 = smov 8  }
 0x350   :  { %809 = dma.vmem_to_hbm [thread:$0]  %s804_s28, 512, %s1298_s3, [#allocation3], %s945_s10, %s945_s10, %s946_s11  }
 0x351   :  { %937 = dma.done.wait [#allocation3], 512  }
 0x352   :  { %938 = vsyncadd [#allocation3], 4294966784 }
 0x353   :  { %939 = dma.done.wait [#allocation5], 128  }
 0x354   :  { %940 = vsyncadd [#allocation5], 4294967168 }
 0x355   :  { %829 = vsyncpa [#allocation3], 1 }
 0x356   :  { %830 = vsyncpa [#allocation5], 1 }

</bundles_post_ra>
